<compile_context>
chip_gen: v7x
topology: tpu7x:2x2x1
jax: 0.10.0
libtpu: 0.0.40
codegen_flags: <defaults>
</compile_context>

<pallas_src>
import functools

import jax
import jax.numpy as jnp
from jax.experimental import pallas as pl
from jax.experimental.pallas import tpu as pltpu


def _round_up(x, m):
    return ((x + m - 1) // m) * m


def _cdiv(a, b):
    return (a + b - 1) // b


# ---------------------------------------------------------------------------
# Kernel
# ---------------------------------------------------------------------------
def _mlp_kernel(x_ref, p_ref, o_ref, *, n_pad):
    """x_ref: (TB, n_pad) f32, TB % 128 == 0.
    p_ref: (n_pad + 336, 128) bf16 packed params.
    o_ref: (TB // 128, 128) f32 compact output (lane s of row b = sample b*128+s).
    """
    r = n_pad
    # Static slices of the packed parameter slab (all segment starts are
    # multiples of 16 sublanes; widths are the full 128 lanes).
    w1 = p_ref[0:r, :]               # (n_pad, 128)  real (n, 20), rest zero
    b1 = p_ref[r:r + 1, :]           # (1, 128)
    w2 = p_ref[r + 16:r + 144, :]    # (128, 128)    real (20, 50)
    b2 = p_ref[r + 144:r + 145, :]
    w3 = p_ref[r + 160:r + 288, :]   # (128, 128)    real (50, 20)
    b3 = p_ref[r + 288:r + 289, :]
    w4 = p_ref[r + 304:r + 305, :]   # (1, 128)      w4^T in lanes 0..19
    b4 = p_ref[r + 320:r + 321, :]   # (1, 128)      b4 broadcast across lanes

    # bf16 operands, f32 accumulation on the MXU.
    x = x_ref[...].astype(jnp.bfloat16)
    h = jnp.maximum(jnp.dot(x, w1, preferred_element_type=jnp.float32) + b1, 0.0)
    h = jnp.maximum(
        jnp.dot(h.astype(jnp.bfloat16), w2, preferred_element_type=jnp.float32) + b2, 0.0)
    h = jnp.maximum(
        jnp.dot(h.astype(jnp.bfloat16), w3, preferred_element_type=jnp.float32) + b3, 0.0)

    # Final 20 -> 1 layer, batch-in-lanes: view the tile as groups of 128
    # samples (layout-preserving split of the major dim), multiply by w4 along
    # the feature axis and lane-reduce.  Result is lane-dense (TB//128, 128).
    tb = h.shape[0]
    h3 = h.reshape(tb // 128, 128, 128)                  # (block, sample, feature)
    z = jnp.sum(h3 * w4.astype(jnp.float32), axis=-1) + b4.astype(jnp.float32)
    o_ref[...] = jax.nn.sigmoid(jnp.maximum(z, 0.0))


# ---------------------------------------------------------------------------
# Parameter packing (host-side, done once)
# ---------------------------------------------------------------------------
def pack_params(params, n):
    """Pack w1..w4, b1..b4 into one lane-padded bf16 slab [n_pad + 336, 128].

    Row layout (n_pad = round_up(n, 16); every segment starts on a 16-row
    boundary to match bf16 sublane tiling):
      [0,        n_pad)   w1   (real rows 0..n-1, cols 0..19)
      row n_pad           b1   (cols 0..19)
      [n_pad+16, +128)    w2   (real 20x50)
      row n_pad+144       b2
      [n_pad+160,+128)    w3   (real 50x20)
      row n_pad+288       b3
      row n_pad+304       w4^T (real 1x20, as a lane row)
      row n_pad+320       b4   (scalar broadcast across all 128 lanes)
    """
    n_pad = _round_up(n, 16)
    r = n_pad
    p = jnp.zeros((n_pad + 336, 128), jnp.float32)
    p = p.at[0:n, 0:20].set(params["w1"])
    p = p.at[r, 0:20].set(params["b1"][0])
    p = p.at[r + 16:r + 36, 0:50].set(params["w2"])
    p = p.at[r + 144, 0:50].set(params["b2"][0])
    p = p.at[r + 160:r + 210, 0:20].set(params["w3"])
    p = p.at[r + 288, 0:20].set(params["b3"][0])
    p = p.at[r + 304, 0:20].set(params["w4"][:, 0])
    p = p.at[r + 320, :].set(params["b4"][0, 0])
    return p.astype(jnp.bfloat16)


# ---------------------------------------------------------------------------
# Wrapper
# ---------------------------------------------------------------------------
def net0_forward(x, packed_params, *, tb_max_rows=16):
    """x: [B, n] float32; packed_params: [round_up(n,16)+336, 128] bf16.

    Returns [B, 1] float32.
    """
    B, n = x.shape
    n_pad = _round_up(n, 16)
    p_rows = n_pad + 336
    assert packed_params.shape == (p_rows, 128)

    # Compact output: 128 samples per lane-row.
    nb_total = _cdiv(B, 128)

    # Tile sizing (in units of 128-sample output rows):
    #   * tiny batches: one tile covering the whole (padded) batch;
    #   * otherwise: 8-row-aligned tiles, and at least 2 tiles so the
    #     "parallel" grid axis shards across both TensorCores on v7x.
    if nb_total <= 8:
        tb_rows = nb_total
    else:
        tb_rows = min(tb_max_rows, _round_up(_cdiv(nb_total, 2), 8))
    tb = tb_rows * 128
    grid = _cdiv(nb_total, tb_rows)

    # Only materialize a padded copy of x when actually needed.
    rows_needed = tb if grid == 1 else B
    if n != n_pad or rows_needed > B:
        x_in = jnp.zeros((max(B, rows_needed), n_pad), jnp.float32).at[:B, :n].set(x)
    else:
        x_in = x

    out = pl.pallas_call(
        functools.partial(_mlp_kernel, n_pad=n_pad),
        out_shape=jax.ShapeDtypeStruct((nb_total, 128), jnp.float32),
        grid=(grid,),
        in_specs=[
            pl.BlockSpec((tb, n_pad), lambda i: (i, 0)),     # batch tile of x
            pl.BlockSpec((p_rows, 128), lambda i: (0, 0)),   # resident bf16 params
        ],
        out_specs=pl.BlockSpec((tb_rows, 128), lambda i: (i, 0)),  # compact, lane-dense
        compiler_params=pltpu.CompilerParams(
            dimension_semantics=("parallel",)),
    )(x_in, packed_params)

    # Flat view: sample b*128+s lives at out[b, s]; drop padded tail.
    return out.reshape(-1)[:B].reshape(B, 1)


# ---------------------------------------------------------------------------
# Parameter init (mirrors Net0.__init__) and pure-JAX f32 reference
# ---------------------------------------------------------------------------
def _xavier_uniform(key, fan_in, fan_out):
    bound = (6.0 / (fan_in + fan_out)) ** 0.5
    return jax.random.uniform(key, (fan_in, fan_out), jnp.float32,
                              minval=-bound, maxval=bound)


def init_params(key, n):
    """Weights: xavier-uniform. Biases: U(-1/sqrt(fan_in), 1/sqrt(fan_in))."""
    dims = [(n, 20), (20, 50), (50, 20), (20, 1)]
    keys = jax.random.split(key, 2 * len(dims))
    params = {}
    for i, (fi, fo) in enumerate(dims):
        params[f"w{i+1}"] = _xavier_uniform(keys[2 * i], fi, fo)
        bb = 1.0 / (fi ** 0.5)
        params[f"b{i+1}"] = jax.random.uniform(
            keys[2 * i + 1], (1, fo), jnp.float32, minval=-bb, maxval=bb)
    return params


def reference_forward(x, params):
    h = jnp.maximum(x @ params["w1"] + params["b1"], 0.0)
    h = jnp.maximum(h @ params["w2"] + params["b2"], 0.0)
    h = jnp.maximum(h @ params["w3"] + params["b3"], 0.0)
    z = jnp.maximum(h @ params["w4"] + params["b4"], 0.0)
    return jax.nn.sigmoid(z)


if __name__ == "__main__":
    key = jax.random.PRNGKey(0)
    k_x, k_p = jax.random.split(key)

    B, n = 8, 16          # small synthetic shapes: batch=8, input features=16
    x = jax.random.normal(k_x, (B, n), jnp.float32)
    params = init_params(k_p, n)
    packed = pack_params(params, n)   # one-time layout plumbing (bf16 slab)

    out = net0_forward(x, packed)
    out = jax.block_until_ready(out)

    ref = reference_forward(x, params)
    assert out.shape == (B, 1)
    # bf16 matmul operands (with f32 accumulation) -> loosened tolerance vs f32 ref.
    assert jnp.allclose(out, ref, atol=2e-2, rtol=0.0), float(jnp.max(jnp.abs(out - ref)))

    print("KERNEL_OK")
</pallas_src>

<mosaic_0001>
module attributes {stable_mosaic.version = 11 : i64} {
  func.func @_mlp_kernel(%arg0: i32, %arg1: memref<128x16xf32, #tpu.memory_space<vmem>>, %arg2: memref<352x128xbf16, #tpu.memory_space<vmem>>, %arg3: memref<1x128xf32, #tpu.memory_space<vmem>>) attributes {dimension_semantics = [#tpu.dimension_semantics<parallel>], iteration_bounds = array<i64: 1>, scalar_prefetch = 0 : i64, scratch_operands = 0 : i64, tpu.core_type = #tpu.core_type<tc>, window_params = [{transform_indices = @transform_0, window_bounds = array<i64: 128, 16>}, {pipeline_mode = #tpu.pipeline_mode<synchronous>, transform_indices = @transform_1, window_bounds = array<i64: 352, 128>}, {transform_indices = @transform_2, window_bounds = array<i64: 1, 128>}]} {
    %c0 = arith.constant 0 : index
    %c0_0 = arith.constant 0 : index
    %0 = vector.load %arg2[%c0, %c0_0] : memref<352x128xbf16, #tpu.memory_space<vmem>>, vector<16x128xbf16>
    %c16 = arith.constant 16 : index
    %c0_1 = arith.constant 0 : index
    %1 = vector.load %arg2[%c16, %c0_1] : memref<352x128xbf16, #tpu.memory_space<vmem>>, vector<1x128xbf16>
    %c32 = arith.constant 32 : index
    %c0_2 = arith.constant 0 : index
    %2 = vector.load %arg2[%c32, %c0_2] : memref<352x128xbf16, #tpu.memory_space<vmem>>, vector<128x128xbf16>
    %c160 = arith.constant 160 : index
    %c0_3 = arith.constant 0 : index
    %3 = vector.load %arg2[%c160, %c0_3] : memref<352x128xbf16, #tpu.memory_space<vmem>>, vector<1x128xbf16>
    %c176 = arith.constant 176 : index
    %c0_4 = arith.constant 0 : index
    %4 = vector.load %arg2[%c176, %c0_4] : memref<352x128xbf16, #tpu.memory_space<vmem>>, vector<128x128xbf16>
    %c304 = arith.constant 304 : index
    %c0_5 = arith.constant 0 : index
    %5 = vector.load %arg2[%c304, %c0_5] : memref<352x128xbf16, #tpu.memory_space<vmem>>, vector<1x128xbf16>
    %c320 = arith.constant 320 : index
    %c0_6 = arith.constant 0 : index
    %6 = vector.load %arg2[%c320, %c0_6] : memref<352x128xbf16, #tpu.memory_space<vmem>>, vector<1x128xbf16>
    %c336 = arith.constant 336 : index
    %c0_7 = arith.constant 0 : index
    %7 = vector.load %arg2[%c336, %c0_7] : memref<352x128xbf16, #tpu.memory_space<vmem>>, vector<1x128xbf16>
    %c0_8 = arith.constant 0 : index
    %c0_9 = arith.constant 0 : index
    %8 = vector.load %arg1[%c0_8, %c0_9] : memref<128x16xf32, #tpu.memory_space<vmem>>, vector<128x16xf32>
    %9 = arith.truncf %8 : vector<128x16xf32> to vector<128x16xbf16>
    %cst = arith.constant dense<0.000000e+00> : vector<128x128xf32>
    %10 = tpu.matmul %9, %0, %cst {dimension_numbers = #tpu.dot_dimension_numbers<[1], [0], [0], [1], [0, 0, 1, 1], [], []>} : vector<128x16xbf16>, vector<16x128xbf16>, vector<128x128xf32> -> vector<128x128xf32>
    %11 = arith.extf %1 : vector<1x128xbf16> to vector<1x128xf32>
    %12 = vector.broadcast %11 : vector<1x128xf32> to vector<128x128xf32>
    %13 = arith.addf %10, %12 : vector<128x128xf32>
    %cst_10 = arith.constant 0.000000e+00 : f32
    %14 = vector.broadcast %cst_10 : f32 to vector<128x128xf32>
    %15 = arith.maximumf %13, %14 : vector<128x128xf32>
    %16 = arith.truncf %15 : vector<128x128xf32> to vector<128x128xbf16>
    %cst_11 = arith.constant dense<0.000000e+00> : vector<128x128xf32>
    %17 = tpu.matmul %16, %2, %cst_11 {dimension_numbers = #tpu.dot_dimension_numbers<[1], [0], [0], [1], [0, 0, 1, 1], [], []>} : vector<128x128xbf16>, vector<128x128xbf16>, vector<128x128xf32> -> vector<128x128xf32>
    %18 = arith.extf %3 : vector<1x128xbf16> to vector<1x128xf32>
    %19 = vector.broadcast %18 : vector<1x128xf32> to vector<128x128xf32>
    %20 = arith.addf %17, %19 : vector<128x128xf32>
    %cst_12 = arith.constant 0.000000e+00 : f32
    %21 = vector.broadcast %cst_12 : f32 to vector<128x128xf32>
    %22 = arith.maximumf %20, %21 : vector<128x128xf32>
    %23 = arith.truncf %22 : vector<128x128xf32> to vector<128x128xbf16>
    %cst_13 = arith.constant dense<0.000000e+00> : vector<128x128xf32>
    %24 = tpu.matmul %23, %4, %cst_13 {dimension_numbers = #tpu.dot_dimension_numbers<[1], [0], [0], [1], [0, 0, 1, 1], [], []>} : vector<128x128xbf16>, vector<128x128xbf16>, vector<128x128xf32> -> vector<128x128xf32>
    %25 = arith.extf %5 : vector<1x128xbf16> to vector<1x128xf32>
    %26 = vector.broadcast %25 : vector<1x128xf32> to vector<128x128xf32>
    %27 = arith.addf %24, %26 : vector<128x128xf32>
    %cst_14 = arith.constant 0.000000e+00 : f32
    %28 = vector.broadcast %cst_14 : f32 to vector<128x128xf32>
    %29 = arith.maximumf %27, %28 : vector<128x128xf32>
    %30 = vector.shape_cast %29 : vector<128x128xf32> to vector<1x128x128xf32>
    %31 = arith.extf %6 : vector<1x128xbf16> to vector<1x128xf32>
    %32 = vector.shape_cast %31 : vector<1x128xf32> to vector<1x1x128xf32>
    %33 = vector.broadcast %32 : vector<1x1x128xf32> to vector<1x128x128xf32>
    %34 = arith.mulf %30, %33 : vector<1x128x128xf32>
    %cst_15 = arith.constant dense<0.000000e+00> : vector<1x128xf32>
    %35 = vector.multi_reduction <add>, %34, %cst_15 [2] : vector<1x128x128xf32> to vector<1x128xf32>
    %36 = arith.extf %7 : vector<1x128xbf16> to vector<1x128xf32>
    %37 = arith.addf %35, %36 : vector<1x128xf32>
    %cst_16 = arith.constant 0.000000e+00 : f32
    %38 = vector.broadcast %cst_16 : f32 to vector<1x128xf32>
    %39 = arith.maximumf %37, %38 : vector<1x128xf32>
    %40 = arith.negf %39 : vector<1x128xf32>
    %41 = math.exp %40 : vector<1x128xf32>
    %cst_17 = arith.constant 1.000000e+00 : f32
    %42 = vector.broadcast %cst_17 : f32 to vector<1x128xf32>
    %43 = arith.addf %42, %41 : vector<1x128xf32>
    %44 = arith.divf %42, %43 : vector<1x128xf32>
    %c0_18 = arith.constant 0 : index
    %c0_19 = arith.constant 0 : index
    %45 = vector.load %arg3[%c0_18, %c0_19] : memref<1x128xf32, #tpu.memory_space<vmem>>, vector<1x128xf32>
    tpu.vector_store %arg3[%c0_18, %c0_19], %44 {strides = array<i32>} : memref<1x128xf32, #tpu.memory_space<vmem>>, vector<1x128xf32>,
    return
  }
  func.func @transform_0(%arg0: i32) -> (i32, i32) {
    %c0_i32 = arith.constant 0 : i32
    %c0_i32_0 = arith.constant 0 : i32
    return %arg0, %c0_i32 : i32, i32
  }
  func.func @transform_1(%arg0: i32) -> (i32, i32) {
    %c0_i32 = arith.constant 0 : i32
    %c0_i32_0 = arith.constant 0 : i32
    %c0_i32_1 = arith.constant 0 : i32
    return %c0_i32, %c0_i32_0 : i32, i32
  }
  func.func @transform_2(%arg0: i32) -> (i32, i32) {
    %c0_i32 = arith.constant 0 : i32
    %c0_i32_0 = arith.constant 0 : i32
    return %arg0, %c0_i32 : i32, i32
  }
}

</mosaic_0001>

<bundles_post_ra>
// kernel: tpu_custom_call.1
= control target key start
LH: loop header
LB: loop body
LE: loop exit
PB: predicated region body
PF: predicated region fallthrough
CT: control target
= control target key end

     0   :  { %7 = vsyncpa [#allocation3], 0  ;;  %s1554_s0 = inlined_call_operand.vmem [shape: f32[128,16], index: 0, kind: input, shape index: {}]   ;;  %s1555_s1 = inlined_call_operand.hbm [shape: bf16[352,128], index: 1, kind: input, shape index: {}]   ;;  %s1556_s2 = inlined_call_operand.hbm [shape: f32[1,128], index: 2, kind: output, shape index: {}]  }
   0x1   :  { %8 = vsyncpa [#allocation4], 0  ;;  %s1345_s9 = smov [#allocation2]   ;;  %s1297_s13 = scalar_lea.hbm %s1555_s1, 2816 }
   0x2   :  { %s16_s10 = sshll.u32 %s1345_s9, 4  ;;  %p1298_p0 = scmp.ne.s32.totalorder %s1555_s1, %s1297_s13  ;;  %s17_s10 = int_to_ptr.vmem [resolvable:$true] %s16_s10 }
   0x3   :  { %p1301_p1 = scmp.lt.u32.totalorder %s1297_s13, %s1555_s1 }
   0x5   :  { %p1303_p2 = pnand %p1301_p1, %p1298_p0 }
   0x7   :  { %1306 = shalt.err (!%p1303_p2)
}
   0x8   :  { %s1307_s18 = scalar_lea.vmem %s17_s10, 2816  ;;  %p1312_p4 = scmp.lt.s32.totalorder %s17_s10, %s17_s10 }
   0x9   :  { %p1308_p3 = scmp.ne.s32.totalorder %s17_s10, %s1307_s18  ;;  %p1313_p5 = scmp.lt.s32.totalorder %s1307_s18, %s1307_s18 }
   0xb   :  { %p1314_p6 = por %p1313_p5, %p1312_p4 }
   0xd   :  { %p1315_p7 = pnand %p1314_p6, %p1308_p3 }
   0xf   :  { %1318 = shalt.err (!%p1315_p7)
}
  0x10   :  { %s1346_s19 = smov 64   ;;  %s1347_s20 = smov 4  }
  0x11   :  { %22 = dma.hbm_to_vmem [thread:$0]  %s1555_s1, 2816, %s17_s10, [#allocation3], %s1346_s19, %s1346_s19, %s1347_s20  }
  0x12   :  { %1341 = dma.done.wait [#allocation3], 2816  }
  0x13   :  { %1342 = vsyncadd [#allocation3], 4294964480  ;;  %v1216_v0 = vld [vmem:[#allocation2] sm:$0xff]   ;;  %v67_v2 = vld [vmem:[%s1554_s0 + $0x8] sm:$0xff]  ;;  %vm101_vm0 = vcmask 130048   ;;  %v91_v39 = vlaneseq  ;;  %vm928_vm1 = vcmask 130112  }
  0x14   :  { %v66_v1 = vld [vmem:[%s1554_s0] sm:$0xff]  ;;  %v68_v3 = vld [vmem:[%s1554_s0 + $0x10] sm:$0xff]  ;;  %1127 = vmatprep.subr.bf16.mxu0 %v1216_v0  ;;  %v69_v5 = vld [vmem:[%s1554_s0 + $0x18] sm:$0xff]  ;;  %vm935_vm2 = vcmask 195712   ;;  %vm942_vm3 = vcmask 261312   ;;  %vm949_vm4 = vcmask 326912  }
  0x15   :  { %v82_v4 = vpack.c.bf16 %v67_v2, %v66_v1  ;;  %v70_v6 = vld [vmem:[%s1554_s0 + $0x20] sm:$0xff]  ;;  %v71_v7 = vld [vmem:[%s1554_s0 + $0x28] sm:$0xff]  ;;  %1128 = vmatpush3.bf16.msra.mxu0 %v1216_v0  ;;  %v83_v8 = vpack.c.bf16 %v69_v5, %v68_v3  ;;  %v72_v10 = vld [vmem:[%s1554_s0 + $0x30] sm:$0xff]  ;;  %v1434_v40 = vshrl.u32 %v91_v39, 7  ;;  %vm956_vm5 = vcmask 392512  }
  0x16   :  { %v84_v9 = vpack.c.bf16 %v71_v7, %v70_v6  ;;  %v73_v11 = vld [vmem:[%s1554_s0 + $0x38] sm:$0xff]  ;;  %v74_v12 = vld [vmem:[%s1554_s0 + $0x40] sm:$0xff]  ;;  %v75_v13 = vld [vmem:[%s1554_s0 + $0x48] sm:$0xff]  ;;  %vm963_vm6 = vcmask 458112   ;;  %vm970_vm7 = vcmask 523712   ;;  %vm977_vm8 = vcmask 589312  }
  0x17   :  { %1129 = vmatprep.mubr.msk.bf16.mxu0 %vm101_vm0, %v82_v4  ;;  %v1217_v14 = vld [vmem:[#allocation2 + $0x10] sm:$0xff]   ;;  %v1218_v15 = vld [vmem:[#allocation2 + $0x18] sm:$0xff]   ;;  %v85_v16 = vpack.c.bf16 %v73_v11, %v72_v10  ;;  %v86_v17 = vpack.c.bf16 %v75_v13, %v74_v12  ;;  %v1219_v18 = vld [vmem:[#allocation2 + $0x20] sm:$0xff]   ;;  %v1437_v43 = vsub.s32 0, %v1434_v40  ;;  %vm984_vm9 = vcmask 654912  }
  0x18   :  { %1130 = vmatmul.mubr.msk.bf16.vlgmr.msra.gmra.mrb[0].mxu0 %vm101_vm0, %v83_v8  ;;  %1145 = vmatprep.subr.bf16.mxu1 %v1217_v14  ;;  %v76_v19 = vld [vmem:[%s1554_s0 + $0x50] sm:$0xff]  ;;  %v77_v20 = vld [vmem:[%s1554_s0 + $0x58] sm:$0xff]  ;;  %v1220_v21 = vld [vmem:[#allocation2 + $0x28] sm:$0xff]   ;;  %vm991_vm10 = vcmask 720512   ;;  %vm998_vm11 = vcmask 786112   ;;  %vm1005_vm12 = vcmask 851712  }
  0x19   :  { %1133 = vmatprep.mubr.msk.bf16.mxu0 %vm101_vm0, %v84_v9  ;;  %1146 = vmatpush3.bf16.msra.mxu1 %v1217_v14  ;;  %v78_v22 = vld [vmem:[%s1554_s0 + $0x60] sm:$0xff]  ;;  %v79_v23 = vld [vmem:[%s1554_s0 + $0x68] sm:$0xff]  ;;  %v87_v24 = vpack.c.bf16 %v77_v20, %v76_v19  ;;  %v1221_v26 = vld [vmem:[#allocation2 + $0x30] sm:$0xff]   ;;  %vm1012_vm13 = vcmask 917312   ;;  %vm1019_vm14 = vcmask 982912   ;;  %vm1026_vm15 = vcmask 1048512  }
  0x1a   :  { %1147 = vmatprep.subr.bf16.mxu1 %v1218_v15  ;;  %v88_v25 = vpack.c.bf16 %v79_v23, %v78_v22  ;;  %v80_v27 = vld [vmem:[%s1554_s0 + $0x70] sm:$0xff]  ;;  %v81_v28 = vld [vmem:[%s1554_s0 + $0x78] sm:$0xff]  ;;  %v1223_v31 = vld [vmem:[#allocation2 + $0x40] sm:$0xff]   ;;  %s1349_s0 = smov [#allocation5]  }
  0x1b   :  { %v1222_v29 = vld [vmem:[#allocation2 + $0x38] sm:$0xff]   ;;  %v89_v30 = vpack.c.bf16 %v81_v28, %v80_v27  ;;  %v1224_v32 = vld [vmem:[#allocation2 + $0x48] sm:$0xff]   ;;  %v1226_v34 = vld [vmem:[#allocation2 + $0x60] sm:$0xff]   ;;  %s1036_s26 = sshll.u32 %s1349_s0, 4  ;;  %s1037_s26 = int_to_ptr.vmem [resolvable:$true] %s1036_s26 }
  0x1c   :  { %v1225_v33 = vld [vmem:[#allocation2 + $0x58] sm:$0xff]   ;;  %v1227_v35 = vld [vmem:[#allocation2 + $0x68] sm:$0xff]   ;;  %v1228_v36 = vld [vmem:[#allocation2 + $0x70] sm:$0xff]   ;;  %s1319_s27 = scalar_lea.vmem %s1037_s26, 16  ;;  %s1323_s28 = scalar_lea.vmem %s1037_s26, 32 }
  0x1d   :  { %1148 = vmatpush3.bf16.msra.mxu1 %v1218_v15  ;;  %1177 = vmatprep.subr.bf16.mxu0 %v1225_v33  ;;  %v1229_v37 = vld [vmem:[#allocation2 + $0x78] sm:$0xff]   ;;  %v1230_v38 = vld [vmem:[#allocation2 + $0x80] sm:$0xff]   ;;  %v29_v41 = vld [vmem:[#allocation2 + $0x8] sm:$0x1]  ;;  %p1320_p8 = scmp.ne.s32.totalorder %s1037_s26, %s1319_s27  ;;  %p1324_p9 = scmp.lt.s32.totalorder %s1037_s26, %s1037_s26 }
  0x1e   :  { %1149 = vmatprep.subr.bf16.mxu1 %v1219_v18  ;;  %1178 = vmatpush3.bf16.msra.mxu0 %v1225_v33  ;;  %v90_v42 = vunpack.c.l.bf16 %v29_v41  ;;  %v65_v41 = vld [vmem:[#allocation2 + $0xa8] sm:$0x1]  ;;  %p1325_p10 = scmp.lt.s32.totalorder %s1323_s28, %s1319_s27 }
  0x1f   :  { %1179 = vmatprep.subr.bf16.mxu0 %v1226_v34 }
  0x20   :  { %1134 = vmatmul.mubr.msk.bf16.gmra.mrb[4].mxu0 %vm101_vm0, %v85_v16  ;;  %v94_v44 = vrot.slane %v90_v42, %v1437_v43  ;;  %v640_v42 = vunpack.c.l.bf16 %v65_v41  ;;  %p1326_p11 = por %p1325_p10, %p1324_p9 }
  0x21   :  { %1137 = vmatprep.mubr.msk.bf16.mxu0 %vm101_vm0, %v86_v17  ;;  %1150 = vmatpush3.bf16.msra.mxu1 %v1219_v18 }
  0x22   :  { %1151 = vmatprep.subr.bf16.mxu1 %v1220_v21  ;;  %1180 = vmatpush3.bf16.msra.mxu0 %v1226_v34  ;;  %p1327_p12 = pnand %p1326_p11, %p1320_p8 }
  0x23   :  { %1181 = vmatprep.subr.bf16.mxu0 %v1227_v35 }
  0x25   :  { %1152 = vmatpush3.bf16.msra.mxu1 %v1220_v21 }
  0x26   :  { %1153 = vmatprep.subr.bf16.mxu1 %v1221_v26  ;;  %1182 = vmatpush3.bf16.msra.mxu0 %v1227_v35 }
  0x27   :  { %1183 = vmatprep.subr.bf16.mxu0 %v1228_v36 }
  0x28   :  { %1138 = vmatmul.mubr.msk.bf16.gmra.mrb[8].mxu0 %vm101_vm0, %v87_v24 }
  0x29   :  { %1141 = vmatprep.mubr.msk.bf16.mxu0 %vm101_vm0, %v88_v25  ;;  %1154 = vmatpush3.bf16.msra.mxu1 %v1221_v26 }
  0x2a   :  { %1155 = vmatprep.subr.bf16.mxu1 %v1222_v29  ;;  %1184 = vmatpush3.bf16.msra.mxu0 %v1228_v36 }
  0x2b   :  { %1185 = vmatprep.subr.bf16.mxu0 %v1229_v37 }
  0x2d   :  { %1156 = vmatpush3.bf16.msra.mxu1 %v1222_v29 }
  0x2e   :  { %1157 = vmatprep.subr.bf16.mxu1 %v1223_v31  ;;  %1186 = vmatpush3.bf16.msra.mxu0 %v1229_v37  ;;  %v1231_v37 = vld [vmem:[#allocation2 + $0x88] sm:$0xff]  }
  0x2f   :  { %1187 = vmatprep.subr.bf16.mxu0 %v1230_v38 }
  0x30   :  { %1142 = vmatmul.mubr.msk.bf16.gmra.mrb[12].mxu0 %vm101_vm0, %v89_v30 }
  0x31   :  { %1158 = vmatpush3.bf16.msra.mxu1 %v1223_v31 }
  0x32   :  { %1159 = vmatprep.subr.bf16.mxu1 %v1224_v32  ;;  %1188 = vmatpush3.bf16.msra.mxu0 %v1230_v38  ;;  %v1232_v38 = vld [vmem:[#allocation2 + $0x90] sm:$0xff]  }
  0x33   :  { %1189 = vmatprep.subr.bf16.mxu0 %v1231_v37 }
  0x35   :  { %1160 = vmatpush3.bf16.msra.mxu1 %v1224_v32 }
  0x36   :  { %1190 = vmatpush3.bf16.msra.mxu0 %v1231_v37 }
  0x37   :  { %1191 = vmatprep.subr.bf16.mxu0 %v1232_v38 }
  0x3a   :  { %1192 = vmatpush3.bf16.msra.mxu0 %v1232_v38 }
  0xeb   :  { %v1131_v45 = vpop.f32.mrb[0].mxu0 }
  0xec   :  { %v169_v46 = vadd.f32 %v1131_v45, %v94_v44  ;;  %v160_v47 = vpop.f32.mrb[1].mxu0  ;;  %v1441_v45 = vrot.slane %v640_v42, %v1437_v43  ;;  %v63_v42 = vld [vmem:[#allocation2 + $0x98] sm:$0x1] }
  0xed   :  { %v161_v48 = vadd.f32 %v160_v47, %v94_v44  ;;  %v1132_v49 = vpop.f32.mrb[2].mxu0 }
  0xee   :  { %v172_v50 = vadd.f32 %v1132_v49, %v94_v44  ;;  %v163_v51 = vpop.f32.mrb[3].mxu0  ;;  %v225_v53 = vmax.f32 %v169_v46, 0.0  ;;  %651 = vbcast.lane.b32.xlu1 %v1441_v45, 264  ;;  %647 = vbcast.lane.b32.xlu0 %v1441_v45, 256 }
  0xef   :  { %v164_v52 = vadd.f32 %v163_v51, %v94_v44  ;;  %v223_v55 = vmax.f32 %v161_v48, 0.0 }
  0xf0   :  { %v226_v54 = vmax.f32 %v172_v50, 0.0 }
  0xf1   :  { %v224_v56 = vmax.f32 %v164_v52, 0.0 }
  0xf2   :  { %v240_v57 = vpack.c.bf16 %v226_v54, %v225_v53  ;;  %655 = vbcast.lane.b32.xlu1 %v1441_v45, 272  ;;  %663 = vbcast.lane.b32.xlu0 %v1441_v45, 288 }
  0xf3   :  { %v1135_v58 = vpop.f32.mrb[4].mxu0  ;;  %v239_v59 = vpack.c.bf16 %v224_v56, %v223_v55 }
  0xf4   :  { %v185_v60 = vadd.f32 %v1135_v58, %v94_v44  ;;  %v176_v61 = vpop.f32.mrb[5].mxu0 }
  0xf5   :  { %v177_v62 = vadd.f32 %v176_v61, %v94_v44  ;;  %v1136_v63 = vpop.f32.mrb[6].mxu0  ;;  %1161 = vmatprep.mubr.bf16.mxu1 %v239_v59 }
  0xf6   :  { %v188_v0 = vadd.f32 %v1136_v63, %v94_v44  ;;  %v179_v1 = vpop.f32.mrb[7].mxu0  ;;  %1162 = vmatmul.mubr.bf16.vlgmr.msra.gmra.mrb[0].mxu1 %v240_v57  ;;  %v229_v3 = vmax.f32 %v185_v60, 0.0  ;;  %659 = vbcast.lane.b32.xlu1 %v1441_v45, 280 }
  0xf7   :  { %v180_v2 = vadd.f32 %v179_v1, %v94_v44  ;;  %v227_v5 = vmax.f32 %v177_v62, 0.0  ;;  %671 = vbcast.lane.b32.xlu0 %v1441_v45, 304 }
  0xf8   :  { %v230_v4 = vmax.f32 %v188_v0, 0.0 }
  0xf9   :  { %v228_v6 = vmax.f32 %v180_v2, 0.0 }
  0xfa   :  { %v242_v7 = vpack.c.bf16 %v230_v4, %v229_v3  ;;  %667 = vbcast.lane.b32.xlu1 %v1441_v45, 296 }
  0xfb   :  { %v241_v8 = vpack.c.bf16 %v228_v6, %v227_v5  ;;  %v1139_v9 = vpop.f32.mrb[8].mxu0  ;;  %679 = vbcast.lane.b32.xlu0 %v1441_v45, 320 }
  0xfc   :  { %v201_v10 = vadd.f32 %v1139_v9, %v94_v44  ;;  %v192_v11 = vpop.f32.mrb[9].mxu0 }
  0xfd   :  { %v193_v12 = vadd.f32 %v192_v11, %v94_v44  ;;  %v1140_v13 = vpop.f32.mrb[10].mxu0  ;;  %1165 = vmatprep.mubr.bf16.mxu1 %v241_v8 }
  0xfe   :  { %v204_v14 = vadd.f32 %v1140_v13, %v94_v44  ;;  %v195_v15 = vpop.f32.mrb[11].mxu0  ;;  %1166 = vmatmul.mubr.bf16.gmra.mrb[4].mxu1 %v242_v7  ;;  %v233_v17 = vmax.f32 %v201_v10, 0.0  ;;  %675 = vbcast.lane.b32.xlu1 %v1441_v45, 312 }
  0xff   :  { %v196_v16 = vadd.f32 %v195_v15, %v94_v44  ;;  %v231_v19 = vmax.f32 %v193_v12, 0.0  ;;  %687 = vbcast.lane.b32.xlu0 %v1441_v45, 336 }
 0x100   :  { %v234_v18 = vmax.f32 %v204_v14, 0.0 }
 0x101   :  { %v232_v20 = vmax.f32 %v196_v16, 0.0 }
 0x102   :  { %v244_v21 = vpack.c.bf16 %v234_v18, %v233_v17  ;;  %683 = vbcast.lane.b32.xlu1 %v1441_v45, 328 }
 0x103   :  { %v243_v22 = vpack.c.bf16 %v232_v20, %v231_v19  ;;  %v1143_v23 = vpop.f32.mrb[12].mxu0  ;;  %695 = vbcast.lane.b32.xlu0 %v1441_v45, 352 }
 0x104   :  { %v217_v24 = vadd.f32 %v1143_v23, %v94_v44  ;;  %v208_v25 = vpop.f32.mrb[13].mxu0 }
 0x105   :  { %v209_v26 = vadd.f32 %v208_v25, %v94_v44  ;;  %v1144_v27 = vpop.f32.mrb[14].mxu0  ;;  %1169 = vmatprep.mubr.bf16.mxu1 %v243_v22 }
 0x106   :  { %v220_v28 = vadd.f32 %v1144_v27, %v94_v44  ;;  %v211_v29 = vpop.f32.mrb[15].mxu0  ;;  %1170 = vmatmul.mubr.bf16.gmra.mrb[8].mxu1 %v244_v21  ;;  %v237_v31 = vmax.f32 %v217_v24, 0.0  ;;  %691 = vbcast.lane.b32.xlu1 %v1441_v45, 344 }
 0x107   :  { %v212_v30 = vadd.f32 %v211_v29, %v94_v44  ;;  %v235_v33 = vmax.f32 %v209_v26, 0.0  ;;  %v46_v44 = vld [vmem:[#allocation2 + $0x50] sm:$0x1] }
 0x108   :  { %v238_v32 = vmax.f32 %v220_v28, 0.0  ;;  %v247_v46 = vunpack.c.l.bf16 %v46_v44  ;;  %v421_v44 = vunpack.c.l.bf16 %v63_v42 }
 0x109   :  { %v236_v34 = vmax.f32 %v212_v30, 0.0 }
 0x10a   :  { %v246_v35 = vpack.c.bf16 %v238_v32, %v237_v31  ;;  %699 = vbcast.lane.b32.xlu1 %v1441_v45, 360  ;;  %v251_v47 = vrot.slane %v247_v46, %v1437_v43  ;;  %v64_v46 = vld [vmem:[#allocation2 + $0xa0] sm:$0x1] }
 0x10b   :  { %v245_v36 = vpack.c.bf16 %v236_v34, %v235_v33 }
 0x10d   :  { %1173 = vmatprep.mubr.bf16.mxu1 %v245_v36 }
 0x10e   :  { %1174 = vmatmul.mubr.bf16.gmra.mrb[12].mxu1 %v246_v35 }
 0x1c9   :  { %v1163_v48 = vpop.f32.mrb[0].mxu1 }
 0x1ca   :  { %v343_v49 = vadd.f32 %v1163_v48, %v251_v47  ;;  %v334_v50 = vpop.f32.mrb[1].mxu1  ;;  %v1459_v48 = vrot.slane %v421_v44, %v1437_v43 }
 0x1cb   :  { %v335_v51 = vadd.f32 %v334_v50, %v251_v47  ;;  %v1164_v52 = vpop.f32.mrb[2].mxu1 }
 0x1cc   :  { %v346_v53 = vadd.f32 %v1164_v52, %v251_v47  ;;  %v337_v54 = vpop.f32.mrb[3].mxu1  ;;  %v399_v56 = vmax.f32 %v343_v49, 0.0  ;;  %v587_v49 = vunpack.c.l.bf16 %v64_v46 }
 0x1cd   :  { %v338_v55 = vadd.f32 %v337_v54, %v251_v47  ;;  %v397_v58 = vmax.f32 %v335_v51, 0.0 }
 0x1ce   :  { %v400_v57 = vmax.f32 %v346_v53, 0.0 }
 0x1cf   :  { %v398_v59 = vmax.f32 %v338_v55, 0.0 }
 0x1d0   :  { %v414_v60 = vpack.c.bf16 %v400_v57, %v399_v56 }
 0x1d1   :  { %v413_v61 = vpack.c.bf16 %v398_v59, %v397_v58  ;;  %v1167_v62 = vpop.f32.mrb[4].mxu1 }
 0x1d2   :  { %v359_v63 = vadd.f32 %v1167_v62, %v251_v47  ;;  %v350_v0 = vpop.f32.mrb[5].mxu1 }
 0x1d3   :  { %v351_v1 = vadd.f32 %v350_v0, %v251_v47  ;;  %v1168_v2 = vpop.f32.mrb[6].mxu1  ;;  %1193 = vmatprep.mubr.bf16.mxu0 %v413_v61 }
 0x1d4   :  { %v362_v3 = vadd.f32 %v1168_v2, %v251_v47  ;;  %v353_v4 = vpop.f32.mrb[7].mxu1  ;;  %1194 = vmatmul.mubr.bf16.vlgmr.msra.gmra.mrb[16].mxu0 %v414_v60  ;;  %v403_v6 = vmax.f32 %v359_v63, 0.0 }
 0x1d5   :  { %v354_v5 = vadd.f32 %v353_v4, %v251_v47  ;;  %v401_v8 = vmax.f32 %v351_v1, 0.0 }
 0x1d6   :  { %v404_v7 = vmax.f32 %v362_v3, 0.0 }
 0x1d7   :  { %v402_v9 = vmax.f32 %v354_v5, 0.0 }
 0x1d8   :  { %v416_v10 = vpack.c.bf16 %v404_v7, %v403_v6 }
 0x1d9   :  { %v415_v11 = vpack.c.bf16 %v402_v9, %v401_v8  ;;  %v1171_v12 = vpop.f32.mrb[8].mxu1 }
 0x1da   :  { %v375_v13 = vadd.f32 %v1171_v12, %v251_v47  ;;  %v366_v14 = vpop.f32.mrb[9].mxu1 }
 0x1db   :  { %v367_v15 = vadd.f32 %v366_v14, %v251_v47  ;;  %v1172_v16 = vpop.f32.mrb[10].mxu1  ;;  %1197 = vmatprep.mubr.bf16.mxu0 %v415_v11 }
 0x1dc   :  { %v378_v17 = vadd.f32 %v1172_v16, %v251_v47  ;;  %v369_v18 = vpop.f32.mrb[11].mxu1  ;;  %1198 = vmatmul.mubr.bf16.gmra.mrb[20].mxu0 %v416_v10  ;;  %v407_v20 = vmax.f32 %v375_v13, 0.0 }
 0x1dd   :  { %v370_v19 = vadd.f32 %v369_v18, %v251_v47  ;;  %v405_v22 = vmax.f32 %v367_v15, 0.0 }
 0x1de   :  { %v408_v21 = vmax.f32 %v378_v17, 0.0 }
 0x1df   :  { %v406_v23 = vmax.f32 %v370_v19, 0.0 }
 0x1e0   :  { %v418_v24 = vpack.c.bf16 %v408_v21, %v407_v20 }
 0x1e1   :  { %v417_v25 = vpack.c.bf16 %v406_v23, %v405_v22  ;;  %v1175_v26 = vpop.f32.mrb[12].mxu1 }
 0x1e2   :  { %v391_v27 = vadd.f32 %v1175_v26, %v251_v47  ;;  %v382_v28 = vpop.f32.mrb[13].mxu1 }
 0x1e3   :  { %v383_v29 = vadd.f32 %v382_v28, %v251_v47  ;;  %v1176_v30 = vpop.f32.mrb[14].mxu1  ;;  %1201 = vmatprep.mubr.bf16.mxu0 %v417_v25 }
 0x1e4   :  { %v394_v31 = vadd.f32 %v1176_v30, %v251_v47  ;;  %v385_v32 = vpop.f32.mrb[15].mxu1  ;;  %1202 = vmatmul.mubr.bf16.gmra.mrb[24].mxu0 %v418_v24  ;;  %v411_v34 = vmax.f32 %v391_v27, 0.0 }
 0x1e5   :  { %v386_v33 = vadd.f32 %v385_v32, %v251_v47  ;;  %v409_v36 = vmax.f32 %v383_v29, 0.0  ;;  %v1463_v47 = vrot.slane %v587_v49, %v1437_v43 }
 0x1e6   :  { %v412_v35 = vmax.f32 %v394_v31, 0.0 }
 0x1e7   :  { %v410_v37 = vmax.f32 %v386_v33, 0.0 }
 0x1e8   :  { %v420_v38 = vpack.c.bf16 %v412_v35, %v411_v34 }
 0x1e9   :  { %v419_v41 = vpack.c.bf16 %v410_v37, %v409_v36 }
 0x1eb   :  { %1205 = vmatprep.mubr.bf16.mxu0 %v419_v41 }
 0x1ec   :  { %1206 = vmatmul.mubr.bf16.gmra.mrb[28].mxu0 %v420_v38 }
 0x2a7   :  { %v1195_v50 = vpop.f32.mrb[16].mxu0 }
 0x2a8   :  { %v517_v51 = vadd.f32 %v1195_v50, %v1459_v48  ;;  %v508_v52 = vpop.f32.mrb[17].mxu0 }
 0x2a9   :  { %v509_v53 = vadd.f32 %v508_v52, %v1459_v48  ;;  %v1196_v54 = vpop.f32.mrb[18].mxu0 }
 0x2aa   :  { %v573_v55 = vmax.f32 %v517_v51, 0.0  ;;  %v520_v56 = vadd.f32 %v1196_v54, %v1459_v48  ;;  %v511_v57 = vpop.f32.mrb[19].mxu0 }
 0x2ab   :  { %v571_v58 = vmax.f32 %v509_v53, 0.0  ;;  %v512_v59 = vadd.f32 %v511_v57, %v1459_v48 }
 0x2ac   :  { %v574_v60 = vmax.f32 %v520_v56, 0.0  ;;  %v594_v61 = vmul.f32 %v1463_v47, %v573_v55  ;;  %v1348_v55 = vmov 0  }
 0x2ad   :  { %v572_v62 = vmax.f32 %v512_v59, 0.0  ;;  %v592_v63 = vmul.f32 %v1463_v47, %v571_v58  ;;  %1214 = vset.pattern.permute.xlu1 %v1348_v55  ;;  %1215 = vset.pattern.permute.xlu0 %v1348_v55  ;;  %v648_v58 = vpop.permute.xlu0 %647 }
 0x2ae   :  { %612 = vadd.xlane.f32.xlu1 %v594_v61  ;;  %v595_v2 = vmul.f32 %v1463_v47, %v574_v60 }
 0x2af   :  { %v1199_v0 = vpop.f32.mrb[20].mxu0  ;;  %608 = vadd.xlane.f32.xlu0 %v592_v63  ;;  %v593_v5 = vmul.f32 %v1463_v47, %v572_v62 }
 0x2b0   :  { %v533_v43 = vadd.f32 %v1199_v0, %v1459_v48  ;;  %v524_v1 = vpop.f32.mrb[21].mxu0 }
 0x2b1   :  { %v525_v3 = vadd.f32 %v524_v1, %v1459_v48  ;;  %v1200_v4 = vpop.f32.mrb[22].mxu0  ;;  %v664_v60 = vpop.permute.xlu0 %663 }
 0x2b2   :  { %v577_v6 = vmax.f32 %v533_v43, 0.0  ;;  %v536_v7 = vadd.f32 %v1200_v4, %v1459_v48  ;;  %614 = vadd.xlane.f32.xlu1 %v595_v2  ;;  %v527_v8 = vpop.f32.mrb[23].mxu0 }
 0x2b3   :  { %v528_v9 = vadd.f32 %v527_v8, %v1459_v48  ;;  %610 = vadd.xlane.f32.xlu0 %v593_v5  ;;  %v575_v12 = vmax.f32 %v525_v3, 0.0 }
 0x2b4   :  { %v578_v10 = vmax.f32 %v536_v7, 0.0  ;;  %v598_v11 = vmul.f32 %v1463_v47, %v577_v6 }
 0x2b5   :  { %v576_v13 = vmax.f32 %v528_v9, 0.0  ;;  %v596_v20 = vmul.f32 %v1463_v47, %v575_v12  ;;  %v672_v62 = vpop.permute.xlu0 %671 }
 0x2b6   :  { %v599_v14 = vmul.f32 %v1463_v47, %v578_v10 }
 0x2b7   :  { %v1203_v15 = vpop.f32.mrb[24].mxu0  ;;  %620 = vadd.xlane.f32.xlu0 %v598_v11  ;;  %v597_v24 = vmul.f32 %v1463_v47, %v576_v13 }
 0x2b8   :  { %v549_v16 = vadd.f32 %v1203_v15, %v1459_v48  ;;  %622 = vadd.xlane.f32.xlu1 %v599_v14  ;;  %v540_v17 = vpop.f32.mrb[25].mxu0 }
 0x2b9   :  { %v541_v18 = vadd.f32 %v540_v17, %v1459_v48  ;;  %v1204_v19 = vpop.f32.mrb[26].mxu0 }
 0x2ba   :  { %v581_v21 = vmax.f32 %v549_v16, 0.0  ;;  %v552_v22 = vadd.f32 %v1204_v19, %v1459_v48  ;;  %v543_v23 = vpop.f32.mrb[27].mxu0 }
 0x2bb   :  { %v544_v25 = vadd.f32 %v543_v23, %v1459_v48  ;;  %616 = vadd.xlane.f32.xlu0 %v596_v20  ;;  %v579_v28 = vmax.f32 %v541_v18, 0.0 }
 0x2bc   :  { %v582_v26 = vmax.f32 %v552_v22, 0.0  ;;  %618 = vadd.xlane.f32.xlu1 %v597_v24  ;;  %v602_v27 = vmul.f32 %v1463_v47, %v581_v21 }
 0x2bd   :  { %v580_v29 = vmax.f32 %v544_v25, 0.0  ;;  %v600_v36 = vmul.f32 %v1463_v47, %v579_v28 }
 0x2be   :  { %v603_v30 = vmul.f32 %v1463_v47, %v582_v26 }
 0x2bf   :  { %v1207_v31 = vpop.f32.mrb[28].mxu0  ;;  %628 = vadd.xlane.f32.xlu0 %v602_v27  ;;  %v601_v42 = vmul.f32 %v1463_v47, %v580_v29 }
 0x2c0   :  { %v565_v32 = vadd.f32 %v1207_v31, %v1459_v48  ;;  %v556_v33 = vpop.f32.mrb[29].mxu0  ;;  %630 = vadd.xlane.f32.xlu1 %v603_v30 }
 0x2c1   :  { %v557_v34 = vadd.f32 %v556_v33, %v1459_v48  ;;  %v1208_v35 = vpop.f32.mrb[30].mxu0 }
 0x2c2   :  { %v585_v37 = vmax.f32 %v565_v32, 0.0  ;;  %v568_v38 = vadd.f32 %v1208_v35, %v1459_v48  ;;  %v559_v41 = vpop.f32.mrb[31].mxu0 }
 0x2c3   :  { %v560_v44 = vadd.f32 %v559_v41, %v1459_v48  ;;  %624 = vadd.xlane.f32.xlu0 %v600_v36  ;;  %v583_v50 = vmax.f32 %v557_v34, 0.0  ;;  %v652_v48 = vpop.permute.xlu1 %651 }
 0x2c4   :  { %v586_v46 = vmax.f32 %v568_v38, 0.0  ;;  %626 = vadd.xlane.f32.xlu1 %v601_v42  ;;  %v606_v49 = vmul.f32 %v1463_v47, %v585_v37 }
 0x2c5   :  { %v584_v51 = vmax.f32 %v560_v44, 0.0  ;;  %v604_v53 = vmul.f32 %v1463_v47, %v583_v50 }
 0x2c6   :  { %v607_v52 = vmul.f32 %v1463_v47, %v586_v46 }
 0x2c7   :  { %636 = vadd.xlane.f32.xlu0 %v606_v49  ;;  %v605_v54 = vmul.f32 %v1463_v47, %v584_v51  ;;  %v656_v56 = vpop.permute.xlu1 %655  ;;  %v680_v47 = vpop.permute.xlu0 %679 }
 0x2c8   :  { %638 = vadd.xlane.f32.xlu1 %v607_v52 }
 0x2cb   :  { %632 = vadd.xlane.f32.xlu0 %v604_v53  ;;  %v660_v57 = vpop.permute.xlu1 %659  ;;  %v688_v43 = vpop.permute.xlu0 %687 }
 0x2cc   :  { %634 = vadd.xlane.f32.xlu1 %v605_v54 }
 0x2cf   :  { %v668_v59 = vpop.permute.xlu1 %667  ;;  %v1502_v2 = vpop.permute.xlu0 %695 }
 0x2d3   :  { %v676_v61 = vpop.permute.xlu1 %675 }
 0x2d7   :  { %v1498_v63 = vpop.permute.xlu1 %683 }
 0x2db   :  { %v692_v0 = vpop.permute.xlu1 %691 }
 0x2dd   :  { %707 = vbcast.lane.b32.xlu1 %v1441_v45, 376 }
 0x2df   :  { %v1500_v1 = vpop.permute.xlu1 %699 }
 0x2e1   :  { %703 = vbcast.lane.b32.xlu0 %v1441_v45, 368 }
 0x33b   :  { %v613_v3 = vpop.xlane.xlu1 %612 }
 0x33c   :  { %v727_v4 = vadd.f32 %v656_v56, %v613_v3  ;;  %v609_v45 = vpop.xlane.xlu0 %608 }
 0x33d   :  { %v725_v5 = vadd.f32 %v648_v58, %v609_v45 }
 0x33e   :  { %v743_v6 = vmax.f32 %v727_v4, 0.0 }
 0x33f   :  { %v741_v7 = vmax.f32 %v725_v5, 0.0  ;;  %v615_v8 = vpop.xlane.xlu1 %614 }
 0x340   :  { %v1072_v9 = vmul.f32 -1.442695, %v743_v6  ;;  %v728_v10 = vadd.f32 %v660_v57, %v615_v8  ;;  %v611_v11 = vpop.xlane.xlu0 %610 }
 0x341   :  { %v1070_v12 = vmul.f32 -1.442695, %v741_v7  ;;  %v726_v13 = vadd.f32 %v652_v48, %v611_v11 }
 0x342   :  { %1233 = vpow2.f32 %v1072_v9  ;;  %v744_v14 = vmax.f32 %v728_v10, 0.0 }
 0x343   :  { %1235 = vpow2.f32 %v1070_v12  ;;  %v742_v15 = vmax.f32 %v726_v13, 0.0 }
 0x344   :  { %v1073_v16 = vmul.f32 -1.442695, %v744_v14  ;;  %v621_v17 = vpop.xlane.xlu0 %620 }
 0x345   :  { %v1071_v18 = vmul.f32 -1.442695, %v742_v15  ;;  %v731_v19 = vadd.f32 %v672_v62, %v621_v17  ;;  %v623_v20 = vpop.xlane.xlu1 %622 }
 0x346   :  { %1237 = vpow2.f32 %v1073_v16  ;;  %v732_v21 = vadd.f32 %v676_v61, %v623_v20 }
 0x347   :  { %1239 = vpow2.f32 %v1071_v18  ;;  %v747_v22 = vmax.f32 %v731_v19, 0.0 }
 0x348   :  { %v748_v23 = vmax.f32 %v732_v21, 0.0  ;;  %v617_v24 = vpop.xlane.xlu0 %616 }
 0x349   :  { %v1076_v25 = vmul.f32 -1.442695, %v747_v22  ;;  %v729_v26 = vadd.f32 %v664_v60, %v617_v24  ;;  %v619_v27 = vpop.xlane.xlu1 %618 }
 0x34a   :  { %v1077_v28 = vmul.f32 -1.442695, %v748_v23  ;;  %v730_v29 = vadd.f32 %v668_v59, %v619_v27 }
 0x34b   :  { %1241 = vpow2.f32 %v1076_v25  ;;  %v745_v30 = vmax.f32 %v729_v26, 0.0 }
 0x34c   :  { %v1234_v31 = vpop.eup %1233  ;;  %1243 = vpow2.f32 %v1077_v28  ;;  %v746_v32 = vmax.f32 %v730_v29, 0.0  ;;  %v629_v33 = vpop.xlane.xlu0 %628 }
 0x34d   :  { %v1236_v34 = vpop.eup %1235  ;;  %v807_v35 = vadd.f32 1.0, %v1234_v31  ;;  %v1074_v36 = vmul.f32 -1.442695, %v745_v30  ;;  %v735_v37 = vadd.f32 %v688_v43, %v629_v33  ;;  %v631_v38 = vpop.xlane.xlu1 %630 }
 0x34e   :  { %v805_v41 = vadd.f32 1.0, %v1236_v34  ;;  %v1075_v42 = vmul.f32 -1.442695, %v746_v32  ;;  %v736_v44 = vadd.f32 %v692_v0, %v631_v38 }
 0x34f   :  { %1245 = vrcp.f32 %v807_v35  ;;  %v751_v46 = vmax.f32 %v735_v37, 0.0 }
 0x350   :  { %v1238_v49 = vpop.eup %1237  ;;  %1247 = vrcp.f32 %v805_v41  ;;  %v752_v50 = vmax.f32 %v736_v44, 0.0  ;;  %v625_v51 = vpop.xlane.xlu0 %624 }
 0x351   :  { %v1240_v52 = vpop.eup %1239  ;;  %v808_v53 = vadd.f32 1.0, %v1238_v49  ;;  %1249 = vpow2.f32 %v1074_v36  ;;  %v1080_v54 = vmul.f32 -1.442695, %v751_v46  ;;  %v733_v55 = vadd.f32 %v680_v47, %v625_v51  ;;  %v627_v48 = vpop.xlane.xlu1 %626 }
 0x352   :  { %v806_v56 = vadd.f32 1.0, %v1240_v52  ;;  %1251 = vpow2.f32 %v1075_v42  ;;  %v1081_v57 = vmul.f32 -1.442695, %v752_v50  ;;  %v734_v58 = vadd.f32 %v1498_v63, %v627_v48 }
 0x353   :  { %1253 = vrcp.f32 %v808_v53  ;;  %v749_v59 = vmax.f32 %v733_v55, 0.0 }
 0x354   :  { %1255 = vrcp.f32 %v806_v56  ;;  %v750_v60 = vmax.f32 %v734_v58, 0.0  ;;  %v637_v61 = vpop.xlane.xlu0 %636 }
 0x355   :  { %v1242_v62 = vpop.eup %1241  ;;  %1257 = vpow2.f32 %v1080_v54  ;;  %v1078_v0 = vmul.f32 -1.442695, %v749_v59  ;;  %v639_v43 = vpop.xlane.xlu1 %638  ;;  %v1508_v59 = vand.u32 127, %v91_v39 }
 0x356   :  { %v1244_v3 = vpop.eup %1243  ;;  %v811_v4 = vadd.f32 1.0, %v1242_v62  ;;  %1259 = vpow2.f32 %v1081_v57  ;;  %v1079_v45 = vmul.f32 -1.442695, %v750_v60 }
 0x357   :  { %v812_v47 = vadd.f32 1.0, %v1244_v3  ;;  %1261 = vpow2.f32 %v1078_v0  ;;  %v923_v60 = vadd.s32 4294967288, %v1508_v59  ;;  %v921_v3 = vsub.s32 %v1508_v59, %v1434_v40 }
 0x358   :  { %1263 = vrcp.f32 %v811_v4  ;;  %v633_v5 = vpop.xlane.xlu0 %632  ;;  %v944_v39 = vadd.s32 4294967264, %v1508_v59 }
 0x359   :  { %v1246_v6 = vpop.eup %1245  ;;  %1265 = vrcp.f32 %v812_v47  ;;  %v737_v63 = vadd.f32 %v1502_v2, %v633_v5  ;;  %v635_v7 = vpop.xlane.xlu1 %634  ;;  %v926_v0 = vsub.s32 %v923_v60, %v1434_v40  ;;  %v937_v5 = vadd.s32 4294967272, %v1508_v59 }
 0x35a   :  { %v1248_v8 = vpop.eup %1247  ;;  %1267 = vpow2.f32 %v1079_v45  ;;  %v738_v9 = vadd.f32 %v1500_v1, %v635_v7  ;;  %876 = vperm.xlu1 %1214, %v1246_v6  }
 0x35b   :  { %v1250_v10 = vpop.eup %1249  ;;  %v753_v11 = vmax.f32 %v737_v63, 0.0  ;;  %870 = vperm.xlu0 %1215, %v1248_v8   ;;  %v951_v8 = vadd.s32 4294967256, %v1508_v59 }
 0x35c   :  { %v1252_v12 = vpop.eup %1251  ;;  %v809_v13 = vadd.f32 1.0, %v1250_v10  ;;  %v754_v14 = vmax.f32 %v738_v9, 0.0  ;;  %v704_v15 = vpop.permute.xlu0 %703 }
 0x35d   :  { %v1254_v16 = vpop.eup %1253  ;;  %v810_v17 = vadd.f32 1.0, %v1252_v12  ;;  %v1082_v18 = vmul.f32 -1.442695, %v753_v11  ;;  %v739_v19 = vadd.f32 %v704_v15, %v637_v61  ;;  %v708_v20 = vpop.permute.xlu1 %707  ;;  %v940_v11 = vsub.s32 %v937_v5, %v1434_v40 }
 0x35e   :  { %v1256_v21 = vpop.eup %1255  ;;  %1269 = vrcp.f32 %v809_v13  ;;  %v1083_v2 = vmul.f32 -1.442695, %v754_v14  ;;  %v740_v22 = vadd.f32 %v708_v20, %v639_v43  ;;  %v930_v43 = vadd.s32 4294967280, %v1508_v59 }
 0x35f   :  { %v1258_v23 = vpop.eup %1257  ;;  %1271 = vrcp.f32 %v810_v17  ;;  %v755_v1 = vmax.f32 %v739_v19, 0.0  ;;  %879 = vperm.xlu0 %1215, %v1254_v16   ;;  %873 = vperm.xlu1 %1214, %v1256_v21   ;;  %v958_v13 = vadd.s32 4294967248, %v1508_v59  ;;  %v947_v14 = vsub.s32 %v944_v39, %v1434_v40 }
 0x360   :  { %v1260_v24 = vpop.eup %1259  ;;  %v815_v25 = vadd.f32 1.0, %v1258_v23  ;;  %1273 = vpow2.f32 %v1082_v18  ;;  %v756_v26 = vmax.f32 %v740_v22, 0.0  ;;  %v933_v6 = vsub.s32 %v930_v43, %v1434_v40 }
 0x361   :  { %v1262_v27 = vpop.eup %1261  ;;  %v816_v28 = vadd.f32 1.0, %v1260_v24  ;;  %1275 = vpow2.f32 %v1083_v2  ;;  %v1084_v29 = vmul.f32 -1.442695, %v755_v1  ;;  %v954_v15 = vsub.s32 %v951_v8, %v1434_v40 }
 0x362   :  { %v1264_v30 = vpop.eup %1263  ;;  %1277 = vrcp.f32 %v815_v25  ;;  %v813_v31 = vadd.f32 1.0, %v1262_v27  ;;  %v1085_v32 = vmul.f32 -1.442695, %v756_v26  ;;  %v965_v18 = vadd.s32 4294967240, %v1508_v59 }
 0x363   :  { %v1266_v33 = vpop.eup %1265  ;;  %1279 = vrcp.f32 %v816_v28  ;;  %888 = vperm.xlu1 %1214, %v1264_v30   ;;  %v961_v20 = vsub.s32 %v958_v13, %v1434_v40  ;;  %v972_v22 = vadd.s32 4294967232, %v1508_v59  ;;  %v979_v24 = vadd.s32 4294967224, %v1508_v59 }
 0x364   :  { %v1268_v34 = vpop.eup %1267  ;;  %1281 = vrcp.f32 %v813_v31  ;;  %891 = vperm.xlu0 %1215, %v1266_v33   ;;  %v968_v26 = vsub.s32 %v965_v18, %v1434_v40  ;;  %v986_v30 = vadd.s32 4294967216, %v1508_v59 }
 0x365   :  { %v814_v35 = vadd.f32 1.0, %v1268_v34  ;;  %1283 = vpow2.f32 %v1084_v29  ;;  %v982_v33 = vsub.s32 %v979_v24, %v1434_v40 }
 0x366   :  { %1285 = vpow2.f32 %v1085_v32  ;;  %v975_v32 = vsub.s32 %v972_v22, %v1434_v40 }
 0x367   :  { %1287 = vrcp.f32 %v814_v35 }
 0x368   :  { %v1270_v36 = vpop.eup %1269 }
 0x369   :  { %v1272_v37 = vpop.eup %1271  ;;  %882 = vperm.xlu1 %1214, %v1270_v36   ;;  %v993_v36 = vadd.s32 4294967208, %v1508_v59 }
 0x36a   :  { %v1274_v38 = vpop.eup %1273  ;;  %885 = vperm.xlu0 %1215, %v1272_v37  }
 0x36b   :  { %v1276_v41 = vpop.eup %1275  ;;  %v817_v42 = vadd.f32 1.0, %v1274_v38  ;;  %v1000_v38 = vadd.s32 4294967200, %v1508_v59 }
 0x36c   :  { %v1278_v44 = vpop.eup %1277  ;;  %v818_v46 = vadd.f32 1.0, %v1276_v41  ;;  %v989_v41 = vsub.s32 %v986_v30, %v1434_v40 }
 0x36d   :  { %v1280_v49 = vpop.eup %1279  ;;  %1289 = vrcp.f32 %v817_v42  ;;  %900 = vperm.xlu1 %1214, %v1278_v44  }
 0x36e   :  { %v1282_v50 = vpop.eup %1281  ;;  %1291 = vrcp.f32 %v818_v46  ;;  %903 = vperm.xlu0 %1215, %v1280_v49  }
 0x36f   :  { %v1284_v51 = vpop.eup %1283 }
 0x370   :  { %v1286_v52 = vpop.eup %1285  ;;  %v819_v53 = vadd.f32 1.0, %v1284_v51 }
 0x371   :  { %v1288_v54 = vpop.eup %1287  ;;  %v820_v55 = vadd.f32 1.0, %v1286_v52  ;;  %894 = vperm.xlu1 %1214, %v1282_v50   ;;  %v1007_v50 = vadd.s32 4294967192, %v1508_v59  ;;  %v996_v52 = vsub.s32 %v993_v36, %v1434_v40 }
 0x372   :  { %1293 = vrcp.f32 %v819_v53  ;;  %897 = vperm.xlu0 %1215, %v1288_v54   ;;  %v1003_v54 = vsub.s32 %v1000_v38, %v1434_v40 }
 0x373   :  { %1295 = vrcp.f32 %v820_v55 }
 0x377   :  { %v1290_v48 = vpop.eup %1289 }
 0x378   :  { %v1292_v56 = vpop.eup %1291  ;;  %906 = vperm.xlu1 %1214, %v1290_v48   ;;  %v1014_v48 = vadd.s32 4294967184, %v1508_v59 }
 0x379   :  { %909 = vperm.xlu0 %1215, %v1292_v56   ;;  %v1010_v56 = vsub.s32 %v1007_v50, %v1434_v40 }
 0x37a   :  { %v1017_v43 = vsub.s32 %v1014_v48, %v1434_v40 }
 0x37c   :  { %v1294_v57 = vpop.eup %1293 }
 0x37d   :  { %v1296_v58 = vpop.eup %1295  ;;  %912 = vperm.xlu1 %1214, %v1294_v57   ;;  %v1021_v57 = vadd.s32 4294967176, %v1508_v59 }
 0x37e   :  { %915 = vperm.xlu0 %1215, %v1296_v58  }
 0x3d9   :  { %v877_v61 = vpop.permute.xlu1 %876 }
 0x3da   :  { %v871_v62 = vpop.permute.xlu0 %870  ;;  %v934_v12 = vrot.slane %v877_v61, %v933_v6 }
 0x3db   :  { %v922_v63 = vrot.slane %v871_v62, %v921_v3 }
 0x3de   :  { %v874_v4 = vpop.permute.xlu1 %873  ;;  %v880_v45 = vpop.permute.xlu0 %879 }
 0x3df   :  { %v927_v47 = vrot.slane %v874_v4, %v926_v0  ;;  %v941_v17 = vrot.slane %v880_v45, %v940_v11  ;;  %v1024_v45 = vsub.s32 %v1021_v57, %v1434_v40 }
 0x3e1   :  { %v929_v10 = vsel %vm928_vm1, %v927_v47, %v922_v63 }
 0x3e2   :  { %v889_v7 = vpop.permute.xlu1 %888  ;;  %v936_v16 = vsel %vm935_vm2, %v934_v12, %v929_v10 }
 0x3e3   :  { %v892_v9 = vpop.permute.xlu0 %891  ;;  %v943_v23 = vsel %vm942_vm3, %v941_v17, %v936_v16  ;;  %v962_v29 = vrot.slane %v889_v7, %v961_v20 }
 0x3e4   :  { %v969_v35 = vrot.slane %v892_v9, %v968_v26 }
 0x3e8   :  { %v883_v19 = vpop.permute.xlu1 %882 }
 0x3e9   :  { %v948_v21 = vrot.slane %v883_v19, %v947_v14  ;;  %v886_v2 = vpop.permute.xlu0 %885 }
 0x3ea   :  { %v955_v1 = vrot.slane %v886_v2, %v954_v15 }
 0x3eb   :  { %v950_v25 = vsel %vm949_vm4, %v948_v21, %v943_v23 }
 0x3ec   :  { %v957_v27 = vsel %vm956_vm5, %v955_v1, %v950_v25  ;;  %v901_v28 = vpop.permute.xlu1 %900 }
 0x3ed   :  { %v904_v31 = vpop.permute.xlu0 %903  ;;  %v964_v34 = vsel %vm963_vm6, %v962_v29, %v957_v27  ;;  %v990_v55 = vrot.slane %v901_v28, %v989_v41 }
 0x3ee   :  { %v971_v46 = vsel %vm970_vm7, %v969_v35, %v964_v34  ;;  %v997_v61 = vrot.slane %v904_v31, %v996_v52 }
 0x3f0   :  { %v895_v37 = vpop.permute.xlu1 %894 }
 0x3f1   :  { %v976_v42 = vrot.slane %v895_v37, %v975_v32  ;;  %v898_v44 = vpop.permute.xlu0 %897 }
 0x3f2   :  { %v983_v49 = vrot.slane %v898_v44, %v982_v33 }
 0x3f3   :  { %v978_v51 = vsel %vm977_vm8, %v976_v42, %v971_v46 }
 0x3f4   :  { %v985_v53 = vsel %vm984_vm9, %v983_v49, %v978_v51 }
 0x3f5   :  { %v992_v58 = vsel %vm991_vm10, %v990_v55, %v985_v53 }
 0x3f6   :  { %v999_v3 = vsel %vm998_vm11, %v997_v61, %v992_v58 }
 0x3f7   :  { %v907_v60 = vpop.permute.xlu1 %906 }
 0x3f8   :  { %v1004_v62 = vrot.slane %v907_v60, %v1003_v54  ;;  %v910_v0 = vpop.permute.xlu0 %909 }
 0x3f9   :  { %v1011_v4 = vrot.slane %v910_v0, %v1010_v56 }
 0x3fa   :  { %v1006_v47 = vsel %vm1005_vm12, %v1004_v62, %v999_v3 }
 0x3fb   :  { %v1013_v39 = vsel %vm1012_vm13, %v1011_v4, %v1006_v47 }
 0x3fc   :  { %v913_v5 = vpop.permute.xlu1 %912 }
 0x3fd   :  { %v1018_v59 = vrot.slane %v913_v5, %v1017_v43  ;;  %v916_v6 = vpop.permute.xlu0 %915 }
 0x3fe   :  { %v1025_v63 = vrot.slane %v916_v6, %v1024_v45 }
 0x3ff   :  { %v1020_v7 = vsel %vm1019_vm14, %v1018_v59, %v1013_v39 }
 0x400   :  { %v1027_v8 = vsel %vm1026_vm15, %v1025_v63, %v1020_v7 }
 0x401   :  { %1029 = vst [vmem:[#allocation5] sm:$0x1] %v1027_v8 }
 0x402   :  { %1330 = shalt.err (!%p1327_p12)
}
 0x403   :  { %s1331_s30 = scalar_lea.hbm %s1556_s2, 16 }
 0x404   :  { %p1332_p13 = scmp.ne.s32.totalorder %s1556_s2, %s1331_s30  ;;  %p1335_p0 = scmp.lt.u32.totalorder %s1331_s30, %s1556_s2 }
 0x406   :  { %p1337_p1 = pnand %p1335_p0, %p1332_p13 }
 0x408   :  { %1340 = shalt.err (!%p1337_p1)
}
 0x409   :  { %1039 = dma.vmem_to_hbm [thread:$0]  %s1037_s26, 16, %s1556_s2, [#allocation4]  }
 0x40a   :  { %1343 = dma.done.wait [#allocation4], 16  }
 0x40b   :  { %1344 = vsyncadd [#allocation4], 4294967280 }
 0x40c   :  { %1043 = vsyncpa [#allocation3], 1 }
 0x40d   :  { %1044 = vsyncpa [#allocation4], 1 }

</bundles_post_ra>
